<compile_context>
chip_gen: v6e
topology: v6e:2x2x1
jax: 0.10.0
libtpu: 0.0.40
codegen_flags: <defaults>
</compile_context>

<pallas_src>
import functools

import numpy as np
import jax
import jax.numpy as jnp
from jax import lax
from jax.experimental import pallas as pl
from jax.experimental.pallas import tpu as pltpu


# --------------------------------------------------------------------------
# Fused kernel: dwconv3x3 -> +bias -> LeakyReLU(0.1) -> dwconv3x3 -> +bias
# --------------------------------------------------------------------------

def _fused_dw_kernel(x_ref, m_ref, w1_ref, b1_ref, w2_ref, b2_ref, o_ref, *,
                     width):
    """One (branch, row-block) tile.

    x_ref : (R, HW)  rows = flattened (batch, channel); lanes = flattened (H, W)
    m_ref : (9, HW)  float boundary masks per 3x3 tap (1 inside image, 0 where
                     the tap would read across the zero-padded border)
    w1_ref: (R, 9)   conv1 taps per row (channel of that row), tap = ky*3 + kx
    b1_ref: (R, 1)
    w2_ref: (R, 9)   conv2 taps
    b2_ref: (R, 1)
    o_ref : (R, HW)
    """
    R, HW = o_ref.shape
    W = width

    x = x_ref[...]
    masks = m_ref[...]
    w1 = w1_ref[...]
    w2 = w2_ref[...]

    def dwconv(v, w, b_ref):
        acc = jnp.zeros((R, HW), jnp.float32)
        for ky in range(3):
            for kx in range(3):
                t = ky * 3 + kx
                delta = (ky - 1) * W + (kx - 1)      # lane offset of this tap
                if delta == 0:
                    sh = v                           # center tap: no shift/mask
                else:
                    # want sh[p] = v[p + delta]; jnp.roll semantics => shift=-delta.
                    # Lanes that wrapped around are exactly the out-of-image
                    # ones and get zeroed by the precomputed boundary mask.
                    sh = pltpu.roll(v, shift=(-delta) % HW, axis=1)
                    sh = sh * masks[t:t + 1, :]
                acc = acc + sh * w[:, t:t + 1]
        return acc + b_ref[...]

    a1 = dwconv(x, w1, b1_ref)
    act = jnp.maximum(a1, 0.1 * a1)                  # LeakyReLU(0.1)
    o_ref[...] = dwconv(act, w2, b2_ref)


# --------------------------------------------------------------------------
# Wrapper / glue
# --------------------------------------------------------------------------

def _boundary_masks(h, w):
    """(9, h*w) float32: 1 where tap (ky, kx) stays inside the image."""
    y = np.arange(h * w, dtype=np.int64) // w
    x = np.arange(h * w, dtype=np.int64) % w
    rows = []
    for ky in range(3):
        oky = y + ky - 1
        for kx in range(3):
            okx = x + kx - 1
            ok = (oky >= 0) & (oky < h) & (okx >= 0) & (okx < w)
            rows.append(ok.astype(np.float32))
    return jnp.asarray(np.stack(rows, axis=0))


def _pick_row_block(rows, hw, bytes_per=4, vmem_budget=8 << 20):
    """Largest row block (full extent, or a multiple of 8 dividing `rows`)
    whose double-buffered in+out tiles stay comfortably inside VMEM (v7x-safe)."""
    if rows * hw * bytes_per * 4 <= vmem_budget:
        return rows
    blk = max(8, ((vmem_budget // (hw * bytes_per * 4)) // 8) * 8)
    blk = min(blk, rows)
    while blk > 8 and rows % blk:
        blk -= 8
    return blk if rows % blk == 0 else rows


def _dw_taps(wt, n):
    """PyTorch depthwise weight (C,1,3,3) -> (N*C, 9), tap index = ky*3 + kx."""
    c = wt.shape[0]
    return jnp.tile(wt.reshape(c, 9), (n, 1))


def _dw_bias(bv, n):
    return jnp.tile(bv, (n,)).reshape(-1, 1)


def fre_block_spa(x, params):
    """x: complex64 NCHW (N, C, H, W), exactly like the PyTorch module."""
    n, c, h, w = x.shape
    hw = h * w
    rows = n * c

    # Real/imag planes as lane-dense (N*C, H*W) slabs -- free reshapes of NCHW.
    stacked = jnp.stack([jnp.real(x).reshape(rows, hw),
                         jnp.imag(x).reshape(rows, hw)], axis=0)       # (2,R,HW)

    w1 = jnp.stack([_dw_taps(params["real"]["c1"]["w"], n),
                    _dw_taps(params["imag"]["c1"]["w"], n)], axis=0)   # (2,R,9)
    w2 = jnp.stack([_dw_taps(params["real"]["c2"]["w"], n),
                    _dw_taps(params["imag"]["c2"]["w"], n)], axis=0)
    b1 = jnp.stack([_dw_bias(params["real"]["c1"]["b"], n),
                    _dw_bias(params["imag"]["c1"]["b"], n)], axis=0)   # (2,R,1)
    b2 = jnp.stack([_dw_bias(params["real"]["c2"]["b"], n),
                    _dw_bias(params["imag"]["c2"]["b"], n)], axis=0)
    masks = _boundary_masks(h, w)                                      # (9,HW)

    rb = _pick_row_block(rows, hw)
    nb = rows // rb

    kernel = functools.partial(_fused_dw_kernel, width=w)
    out = pl.pallas_call(
        kernel,
        out_shape=jax.ShapeDtypeStruct((2, rows, hw), jnp.float32),
        grid=(2, nb),
        in_specs=[
            pl.BlockSpec((None, rb, hw), lambda b, r: (b, r, 0)),
            pl.BlockSpec((9, hw), lambda b, r: (0, 0)),
            pl.BlockSpec((None, rb, 9), lambda b, r: (b, r, 0)),
            pl.BlockSpec((None, rb, 1), lambda b, r: (b, r, 0)),
            pl.BlockSpec((None, rb, 9), lambda b, r: (b, r, 0)),
            pl.BlockSpec((None, rb, 1), lambda b, r: (b, r, 0)),
        ],
        out_specs=pl.BlockSpec((None, rb, hw), lambda b, r: (b, r, 0)),
        compiler_params=pltpu.CompilerParams(
            dimension_semantics=("parallel", "parallel")),
    )(stacked, masks, w1, b1, w2, b2)

    return lax.complex(out[0].reshape(n, c, h, w),
                       out[1].reshape(n, c, h, w))


# --------------------------------------------------------------------------
# Deterministic parameter init (PyTorch weight shapes) + XLA reference
# --------------------------------------------------------------------------

def init_fre_block_spa(key, nc):
    def conv_dw(k):
        k1, k2 = jax.random.split(k)
        return {"w": 0.1 * jax.random.normal(k1, (nc, 1, 3, 3), jnp.float32),
                "b": 0.1 * jax.random.normal(k2, (nc,), jnp.float32)}
    ks = jax.random.split(key, 4)
    return {"real": {"c1": conv_dw(ks[0]), "c2": conv_dw(ks[1])},
            "imag": {"c1": conv_dw(ks[2]), "c2": conv_dw(ks[3])}}


def _ref_branch(v_nchw, p1, p2):
    def dw(v, p):
        return lax.conv_general_dilated(
            v, p["w"], window_strides=(1, 1), padding=((1, 1), (1, 1)),
            dimension_numbers=("NCHW", "OIHW", "NCHW"),
            feature_group_count=v.shape[1]) + p["b"][None, :, None, None]
    v = dw(v_nchw, p1)
    v = jnp.where(v >= 0, v, 0.1 * v)
    return dw(v, p2)


# --------------------------------------------------------------------------

if __name__ == "__main__":
    nc, n, h, w = 4, 2, 16, 16            # PyTorch complex input NCHW (2, 4, 16, 16)
    kx, kp = jax.random.split(jax.random.PRNGKey(0))
    kr, ki = jax.random.split(kx)
    x = lax.complex(jax.random.normal(kr, (n, nc, h, w), jnp.float32),
                    jax.random.normal(ki, (n, nc, h, w), jnp.float32))
    params = init_fre_block_spa(kp, nc)

    fwd = jax.jit(functools.partial(fre_block_spa, params=params))
    out = jax.block_until_ready(fwd(x))

    assert out.shape == (n, nc, h, w)
    assert out.dtype == jnp.complex64
    assert bool(jnp.all(jnp.isfinite(jnp.abs(out))))

    # Correctness vs XLA's grouped conv (same math as the PyTorch module).
    ref = lax.complex(
        _ref_branch(jnp.real(x), params["real"]["c1"], params["real"]["c2"]),
        _ref_branch(jnp.imag(x), params["imag"]["c1"], params["imag"]["c2"]))
    err = float(jnp.max(jnp.abs(out - ref)))
    assert err < 1e-4, f"max abs err {err}"

    print("KERNEL_OK")
</pallas_src>

<mosaic_0001>
module attributes {stable_mosaic.version = 11 : i64} {
  func.func @_fused_dw_kernel(%arg0: i32, %arg1: i32, %arg2: memref<1x8x256xf32, #tpu.memory_space<vmem>>, %arg3: memref<9x256xf32, #tpu.memory_space<vmem>>, %arg4: memref<1x8x9xf32, #tpu.memory_space<vmem>>, %arg5: memref<1x8x1xf32, #tpu.memory_space<vmem>>, %arg6: memref<1x8x9xf32, #tpu.memory_space<vmem>>, %arg7: memref<1x8x1xf32, #tpu.memory_space<vmem>>, %arg8: memref<1x8x256xf32, #tpu.memory_space<vmem>>) attributes {dimension_semantics = [#tpu.dimension_semantics<parallel>, #tpu.dimension_semantics<parallel>], iteration_bounds = array<i64: 2, 1>, scalar_prefetch = 0 : i64, scratch_operands = 0 : i64, tpu.core_type = #tpu.core_type<tc>, window_params = [{transform_indices = @transform_0, window_bounds = array<i64: 1, 8, 256>}, {pipeline_mode = #tpu.pipeline_mode<synchronous>, transform_indices = @transform_1, window_bounds = array<i64: 9, 256>}, {transform_indices = @transform_2, window_bounds = array<i64: 1, 8, 9>}, {transform_indices = @transform_3, window_bounds = array<i64: 1, 8, 1>}, {transform_indices = @transform_4, window_bounds = array<i64: 1, 8, 9>}, {transform_indices = @transform_5, window_bounds = array<i64: 1, 8, 1>}, {transform_indices = @transform_6, window_bounds = array<i64: 1, 8, 256>}]} {
    %c0 = arith.constant 0 : index
    %c0_0 = arith.constant 0 : index
    %c0_1 = arith.constant 0 : index
    %0 = vector.load %arg2[%c0, %c0_0, %c0_1] : memref<1x8x256xf32, #tpu.memory_space<vmem>>, vector<1x8x256xf32>
    %1 = vector.shape_cast %0 : vector<1x8x256xf32> to vector<8x256xf32>
    %c0_2 = arith.constant 0 : index
    %c0_3 = arith.constant 0 : index
    %2 = vector.load %arg3[%c0_2, %c0_3] : memref<9x256xf32, #tpu.memory_space<vmem>>, vector<9x256xf32>
    %c0_4 = arith.constant 0 : index
    %c0_5 = arith.constant 0 : index
    %c0_6 = arith.constant 0 : index
    %3 = vector.load %arg4[%c0_4, %c0_5, %c0_6] : memref<1x8x9xf32, #tpu.memory_space<vmem>>, vector<1x8x9xf32>
    %4 = vector.shape_cast %3 : vector<1x8x9xf32> to vector<8x9xf32>
    %c0_7 = arith.constant 0 : index
    %c0_8 = arith.constant 0 : index
    %c0_9 = arith.constant 0 : index
    %5 = vector.load %arg6[%c0_7, %c0_8, %c0_9] : memref<1x8x9xf32, #tpu.memory_space<vmem>>, vector<1x8x9xf32>
    %6 = vector.shape_cast %5 : vector<1x8x9xf32> to vector<8x9xf32>
    %cst = arith.constant 0.000000e+00 : f32
    %7 = vector.broadcast %cst : f32 to vector<8x256xf32>
    %c17_i32 = arith.constant 17 : i32
    %8 = tpu.dynamic_rotate %1 by %c17_i32 dim 1 : vector<8x256xf32>, i32 -> vector<8x256xf32>
    %9 = vector.extract_strided_slice %2 {offsets = [0, 0], sizes = [1, 256], strides = [1, 1]} : vector<9x256xf32> to vector<1x256xf32>
    %10 = vector.broadcast %9 : vector<1x256xf32> to vector<8x256xf32>
    %11 = arith.mulf %8, %10 : vector<8x256xf32>
    %12 = vector.extract_strided_slice %4 {offsets = [0, 0], sizes = [8, 1], strides = [1, 1]} : vector<8x9xf32> to vector<8x1xf32>
    %13 = vector.broadcast %12 : vector<8x1xf32> to vector<8x256xf32>
    %14 = arith.mulf %11, %13 : vector<8x256xf32>
    %15 = arith.addf %7, %14 : vector<8x256xf32>
    %c16_i32 = arith.constant 16 : i32
    %16 = tpu.dynamic_rotate %1 by %c16_i32 dim 1 : vector<8x256xf32>, i32 -> vector<8x256xf32>
    %17 = vector.extract_strided_slice %2 {offsets = [1, 0], sizes = [1, 256], strides = [1, 1]} : vector<9x256xf32> to vector<1x256xf32>
    %18 = vector.broadcast %17 : vector<1x256xf32> to vector<8x256xf32>
    %19 = arith.mulf %16, %18 : vector<8x256xf32>
    %20 = vector.extract_strided_slice %4 {offsets = [0, 1], sizes = [8, 1], strides = [1, 1]} : vector<8x9xf32> to vector<8x1xf32>
    %21 = vector.broadcast %20 : vector<8x1xf32> to vector<8x256xf32>
    %22 = arith.mulf %19, %21 : vector<8x256xf32>
    %23 = arith.addf %15, %22 : vector<8x256xf32>
    %c15_i32 = arith.constant 15 : i32
    %24 = tpu.dynamic_rotate %1 by %c15_i32 dim 1 : vector<8x256xf32>, i32 -> vector<8x256xf32>
    %25 = vector.extract_strided_slice %2 {offsets = [2, 0], sizes = [1, 256], strides = [1, 1]} : vector<9x256xf32> to vector<1x256xf32>
    %26 = vector.broadcast %25 : vector<1x256xf32> to vector<8x256xf32>
    %27 = arith.mulf %24, %26 : vector<8x256xf32>
    %28 = vector.extract_strided_slice %4 {offsets = [0, 2], sizes = [8, 1], strides = [1, 1]} : vector<8x9xf32> to vector<8x1xf32>
    %29 = vector.broadcast %28 : vector<8x1xf32> to vector<8x256xf32>
    %30 = arith.mulf %27, %29 : vector<8x256xf32>
    %31 = arith.addf %23, %30 : vector<8x256xf32>
    %c1_i32 = arith.constant 1 : i32
    %32 = tpu.dynamic_rotate %1 by %c1_i32 dim 1 : vector<8x256xf32>, i32 -> vector<8x256xf32>
    %33 = vector.extract_strided_slice %2 {offsets = [3, 0], sizes = [1, 256], strides = [1, 1]} : vector<9x256xf32> to vector<1x256xf32>
    %34 = vector.broadcast %33 : vector<1x256xf32> to vector<8x256xf32>
    %35 = arith.mulf %32, %34 : vector<8x256xf32>
    %36 = vector.extract_strided_slice %4 {offsets = [0, 3], sizes = [8, 1], strides = [1, 1]} : vector<8x9xf32> to vector<8x1xf32>
    %37 = vector.broadcast %36 : vector<8x1xf32> to vector<8x256xf32>
    %38 = arith.mulf %35, %37 : vector<8x256xf32>
    %39 = arith.addf %31, %38 : vector<8x256xf32>
    %40 = vector.extract_strided_slice %4 {offsets = [0, 4], sizes = [8, 1], strides = [1, 1]} : vector<8x9xf32> to vector<8x1xf32>
    %41 = vector.broadcast %40 : vector<8x1xf32> to vector<8x256xf32>
    %42 = arith.mulf %1, %41 : vector<8x256xf32>
    %43 = arith.addf %39, %42 : vector<8x256xf32>
    %c255_i32 = arith.constant 255 : i32
    %44 = tpu.dynamic_rotate %1 by %c255_i32 dim 1 : vector<8x256xf32>, i32 -> vector<8x256xf32>
    %45 = vector.extract_strided_slice %2 {offsets = [5, 0], sizes = [1, 256], strides = [1, 1]} : vector<9x256xf32> to vector<1x256xf32>
    %46 = vector.broadcast %45 : vector<1x256xf32> to vector<8x256xf32>
    %47 = arith.mulf %44, %46 : vector<8x256xf32>
    %48 = vector.extract_strided_slice %4 {offsets = [0, 5], sizes = [8, 1], strides = [1, 1]} : vector<8x9xf32> to vector<8x1xf32>
    %49 = vector.broadcast %48 : vector<8x1xf32> to vector<8x256xf32>
    %50 = arith.mulf %47, %49 : vector<8x256xf32>
    %51 = arith.addf %43, %50 : vector<8x256xf32>
    %c241_i32 = arith.constant 241 : i32
    %52 = tpu.dynamic_rotate %1 by %c241_i32 dim 1 : vector<8x256xf32>, i32 -> vector<8x256xf32>
    %53 = vector.extract_strided_slice %2 {offsets = [6, 0], sizes = [1, 256], strides = [1, 1]} : vector<9x256xf32> to vector<1x256xf32>
    %54 = vector.broadcast %53 : vector<1x256xf32> to vector<8x256xf32>
    %55 = arith.mulf %52, %54 : vector<8x256xf32>
    %56 = vector.extract_strided_slice %4 {offsets = [0, 6], sizes = [8, 1], strides = [1, 1]} : vector<8x9xf32> to vector<8x1xf32>
    %57 = vector.broadcast %56 : vector<8x1xf32> to vector<8x256xf32>
    %58 = arith.mulf %55, %57 : vector<8x256xf32>
    %59 = arith.addf %51, %58 : vector<8x256xf32>
    %c240_i32 = arith.constant 240 : i32
    %60 = tpu.dynamic_rotate %1 by %c240_i32 dim 1 : vector<8x256xf32>, i32 -> vector<8x256xf32>
    %61 = vector.extract_strided_slice %2 {offsets = [7, 0], sizes = [1, 256], strides = [1, 1]} : vector<9x256xf32> to vector<1x256xf32>
    %62 = vector.broadcast %61 : vector<1x256xf32> to vector<8x256xf32>
    %63 = arith.mulf %60, %62 : vector<8x256xf32>
    %64 = vector.extract_strided_slice %4 {offsets = [0, 7], sizes = [8, 1], strides = [1, 1]} : vector<8x9xf32> to vector<8x1xf32>
    %65 = vector.broadcast %64 : vector<8x1xf32> to vector<8x256xf32>
    %66 = arith.mulf %63, %65 : vector<8x256xf32>
    %67 = arith.addf %59, %66 : vector<8x256xf32>
    %c239_i32 = arith.constant 239 : i32
    %68 = tpu.dynamic_rotate %1 by %c239_i32 dim 1 : vector<8x256xf32>, i32 -> vector<8x256xf32>
    %69 = vector.extract_strided_slice %2 {offsets = [8, 0], sizes = [1, 256], strides = [1, 1]} : vector<9x256xf32> to vector<1x256xf32>
    %70 = vector.broadcast %69 : vector<1x256xf32> to vector<8x256xf32>
    %71 = arith.mulf %68, %70 : vector<8x256xf32>
    %72 = vector.extract_strided_slice %4 {offsets = [0, 8], sizes = [8, 1], strides = [1, 1]} : vector<8x9xf32> to vector<8x1xf32>
    %73 = vector.broadcast %72 : vector<8x1xf32> to vector<8x256xf32>
    %74 = arith.mulf %71, %73 : vector<8x256xf32>
    %75 = arith.addf %67, %74 : vector<8x256xf32>
    %c0_10 = arith.constant 0 : index
    %c0_11 = arith.constant 0 : index
    %c0_12 = arith.constant 0 : index
    %76 = vector.load %arg5[%c0_10, %c0_11, %c0_12] : memref<1x8x1xf32, #tpu.memory_space<vmem>>, vector<1x8x1xf32>
    %77 = vector.shape_cast %76 : vector<1x8x1xf32> to vector<8x1xf32>
    %78 = vector.broadcast %77 : vector<8x1xf32> to vector<8x256xf32>
    %79 = arith.addf %75, %78 : vector<8x256xf32>
    %cst_13 = arith.constant 1.000000e-01 : f32
    %80 = vector.broadcast %cst_13 : f32 to vector<8x256xf32>
    %81 = arith.mulf %80, %79 : vector<8x256xf32>
    %82 = arith.maximumf %79, %81 : vector<8x256xf32>
    %cst_14 = arith.constant 0.000000e+00 : f32
    %83 = vector.broadcast %cst_14 : f32 to vector<8x256xf32>
    %c17_i32_15 = arith.constant 17 : i32
    %84 = tpu.dynamic_rotate %82 by %c17_i32_15 dim 1 : vector<8x256xf32>, i32 -> vector<8x256xf32>
    %85 = vector.extract_strided_slice %2 {offsets = [0, 0], sizes = [1, 256], strides = [1, 1]} : vector<9x256xf32> to vector<1x256xf32>
    %86 = vector.broadcast %85 : vector<1x256xf32> to vector<8x256xf32>
    %87 = arith.mulf %84, %86 : vector<8x256xf32>
    %88 = vector.extract_strided_slice %6 {offsets = [0, 0], sizes = [8, 1], strides = [1, 1]} : vector<8x9xf32> to vector<8x1xf32>
    %89 = vector.broadcast %88 : vector<8x1xf32> to vector<8x256xf32>
    %90 = arith.mulf %87, %89 : vector<8x256xf32>
    %91 = arith.addf %83, %90 : vector<8x256xf32>
    %c16_i32_16 = arith.constant 16 : i32
    %92 = tpu.dynamic_rotate %82 by %c16_i32_16 dim 1 : vector<8x256xf32>, i32 -> vector<8x256xf32>
    %93 = vector.extract_strided_slice %2 {offsets = [1, 0], sizes = [1, 256], strides = [1, 1]} : vector<9x256xf32> to vector<1x256xf32>
    %94 = vector.broadcast %93 : vector<1x256xf32> to vector<8x256xf32>
    %95 = arith.mulf %92, %94 : vector<8x256xf32>
    %96 = vector.extract_strided_slice %6 {offsets = [0, 1], sizes = [8, 1], strides = [1, 1]} : vector<8x9xf32> to vector<8x1xf32>
    %97 = vector.broadcast %96 : vector<8x1xf32> to vector<8x256xf32>
    %98 = arith.mulf %95, %97 : vector<8x256xf32>
    %99 = arith.addf %91, %98 : vector<8x256xf32>
    %c15_i32_17 = arith.constant 15 : i32
    %100 = tpu.dynamic_rotate %82 by %c15_i32_17 dim 1 : vector<8x256xf32>, i32 -> vector<8x256xf32>
    %101 = vector.extract_strided_slice %2 {offsets = [2, 0], sizes = [1, 256], strides = [1, 1]} : vector<9x256xf32> to vector<1x256xf32>
    %102 = vector.broadcast %101 : vector<1x256xf32> to vector<8x256xf32>
    %103 = arith.mulf %100, %102 : vector<8x256xf32>
    %104 = vector.extract_strided_slice %6 {offsets = [0, 2], sizes = [8, 1], strides = [1, 1]} : vector<8x9xf32> to vector<8x1xf32>
    %105 = vector.broadcast %104 : vector<8x1xf32> to vector<8x256xf32>
    %106 = arith.mulf %103, %105 : vector<8x256xf32>
    %107 = arith.addf %99, %106 : vector<8x256xf32>
    %c1_i32_18 = arith.constant 1 : i32
    %108 = tpu.dynamic_rotate %82 by %c1_i32_18 dim 1 : vector<8x256xf32>, i32 -> vector<8x256xf32>
    %109 = vector.extract_strided_slice %2 {offsets = [3, 0], sizes = [1, 256], strides = [1, 1]} : vector<9x256xf32> to vector<1x256xf32>
    %110 = vector.broadcast %109 : vector<1x256xf32> to vector<8x256xf32>
    %111 = arith.mulf %108, %110 : vector<8x256xf32>
    %112 = vector.extract_strided_slice %6 {offsets = [0, 3], sizes = [8, 1], strides = [1, 1]} : vector<8x9xf32> to vector<8x1xf32>
    %113 = vector.broadcast %112 : vector<8x1xf32> to vector<8x256xf32>
    %114 = arith.mulf %111, %113 : vector<8x256xf32>
    %115 = arith.addf %107, %114 : vector<8x256xf32>
    %116 = vector.extract_strided_slice %6 {offsets = [0, 4], sizes = [8, 1], strides = [1, 1]} : vector<8x9xf32> to vector<8x1xf32>
    %117 = vector.broadcast %116 : vector<8x1xf32> to vector<8x256xf32>
    %118 = arith.mulf %82, %117 : vector<8x256xf32>
    %119 = arith.addf %115, %118 : vector<8x256xf32>
    %c255_i32_19 = arith.constant 255 : i32
    %120 = tpu.dynamic_rotate %82 by %c255_i32_19 dim 1 : vector<8x256xf32>, i32 -> vector<8x256xf32>
    %121 = vector.extract_strided_slice %2 {offsets = [5, 0], sizes = [1, 256], strides = [1, 1]} : vector<9x256xf32> to vector<1x256xf32>
    %122 = vector.broadcast %121 : vector<1x256xf32> to vector<8x256xf32>
    %123 = arith.mulf %120, %122 : vector<8x256xf32>
    %124 = vector.extract_strided_slice %6 {offsets = [0, 5], sizes = [8, 1], strides = [1, 1]} : vector<8x9xf32> to vector<8x1xf32>
    %125 = vector.broadcast %124 : vector<8x1xf32> to vector<8x256xf32>
    %126 = arith.mulf %123, %125 : vector<8x256xf32>
    %127 = arith.addf %119, %126 : vector<8x256xf32>
    %c241_i32_20 = arith.constant 241 : i32
    %128 = tpu.dynamic_rotate %82 by %c241_i32_20 dim 1 : vector<8x256xf32>, i32 -> vector<8x256xf32>
    %129 = vector.extract_strided_slice %2 {offsets = [6, 0], sizes = [1, 256], strides = [1, 1]} : vector<9x256xf32> to vector<1x256xf32>
    %130 = vector.broadcast %129 : vector<1x256xf32> to vector<8x256xf32>
    %131 = arith.mulf %128, %130 : vector<8x256xf32>
    %132 = vector.extract_strided_slice %6 {offsets = [0, 6], sizes = [8, 1], strides = [1, 1]} : vector<8x9xf32> to vector<8x1xf32>
    %133 = vector.broadcast %132 : vector<8x1xf32> to vector<8x256xf32>
    %134 = arith.mulf %131, %133 : vector<8x256xf32>
    %135 = arith.addf %127, %134 : vector<8x256xf32>
    %c240_i32_21 = arith.constant 240 : i32
    %136 = tpu.dynamic_rotate %82 by %c240_i32_21 dim 1 : vector<8x256xf32>, i32 -> vector<8x256xf32>
    %137 = vector.extract_strided_slice %2 {offsets = [7, 0], sizes = [1, 256], strides = [1, 1]} : vector<9x256xf32> to vector<1x256xf32>
    %138 = vector.broadcast %137 : vector<1x256xf32> to vector<8x256xf32>
    %139 = arith.mulf %136, %138 : vector<8x256xf32>
    %140 = vector.extract_strided_slice %6 {offsets = [0, 7], sizes = [8, 1], strides = [1, 1]} : vector<8x9xf32> to vector<8x1xf32>
    %141 = vector.broadcast %140 : vector<8x1xf32> to vector<8x256xf32>
    %142 = arith.mulf %139, %141 : vector<8x256xf32>
    %143 = arith.addf %135, %142 : vector<8x256xf32>
    %c239_i32_22 = arith.constant 239 : i32
    %144 = tpu.dynamic_rotate %82 by %c239_i32_22 dim 1 : vector<8x256xf32>, i32 -> vector<8x256xf32>
    %145 = vector.extract_strided_slice %2 {offsets = [8, 0], sizes = [1, 256], strides = [1, 1]} : vector<9x256xf32> to vector<1x256xf32>
    %146 = vector.broadcast %145 : vector<1x256xf32> to vector<8x256xf32>
    %147 = arith.mulf %144, %146 : vector<8x256xf32>
    %148 = vector.extract_strided_slice %6 {offsets = [0, 8], sizes = [8, 1], strides = [1, 1]} : vector<8x9xf32> to vector<8x1xf32>
    %149 = vector.broadcast %148 : vector<8x1xf32> to vector<8x256xf32>
    %150 = arith.mulf %147, %149 : vector<8x256xf32>
    %151 = arith.addf %143, %150 : vector<8x256xf32>
    %c0_23 = arith.constant 0 : index
    %c0_24 = arith.constant 0 : index
    %c0_25 = arith.constant 0 : index
    %152 = vector.load %arg7[%c0_23, %c0_24, %c0_25] : memref<1x8x1xf32, #tpu.memory_space<vmem>>, vector<1x8x1xf32>
    %153 = vector.shape_cast %152 : vector<1x8x1xf32> to vector<8x1xf32>
    %154 = vector.broadcast %153 : vector<8x1xf32> to vector<8x256xf32>
    %155 = arith.addf %151, %154 : vector<8x256xf32>
    %c0_26 = arith.constant 0 : index
    %c0_27 = arith.constant 0 : index
    %c0_28 = arith.constant 0 : index
    %156 = vector.load %arg8[%c0_26, %c0_27, %c0_28] : memref<1x8x256xf32, #tpu.memory_space<vmem>>, vector<1x8x256xf32>
    %157 = vector.shape_cast %156 : vector<1x8x256xf32> to vector<8x256xf32>
    %158 = vector.shape_cast %155 : vector<8x256xf32> to vector<1x8x256xf32>
    tpu.vector_store %arg8[%c0_26, %c0_27, %c0_28], %158 {strides = array<i32>} : memref<1x8x256xf32, #tpu.memory_space<vmem>>, vector<1x8x256xf32>,
    return
  }
  func.func @transform_0(%arg0: i32, %arg1: i32) -> (i32, i32, i32) {
    %c0_i32 = arith.constant 0 : i32
    %c0_i32_0 = arith.constant 0 : i32
    return %arg0, %arg1, %c0_i32 : i32, i32, i32
  }
  func.func @transform_1(%arg0: i32, %arg1: i32) -> (i32, i32) {
    %c0_i32 = arith.constant 0 : i32
    %c0_i32_0 = arith.constant 0 : i32
    %c0_i32_1 = arith.constant 0 : i32
    return %c0_i32, %c0_i32_0 : i32, i32
  }
  func.func @transform_2(%arg0: i32, %arg1: i32) -> (i32, i32, i32) {
    %c0_i32 = arith.constant 0 : i32
    %c0_i32_0 = arith.constant 0 : i32
    return %arg0, %arg1, %c0_i32 : i32, i32, i32
  }
  func.func @transform_3(%arg0: i32, %arg1: i32) -> (i32, i32, i32) {
    %c0_i32 = arith.constant 0 : i32
    %c0_i32_0 = arith.constant 0 : i32
    return %arg0, %arg1, %c0_i32 : i32, i32, i32
  }
  func.func @transform_4(%arg0: i32, %arg1: i32) -> (i32, i32, i32) {
    %c0_i32 = arith.constant 0 : i32
    %c0_i32_0 = arith.constant 0 : i32
    return %arg0, %arg1, %c0_i32 : i32, i32, i32
  }
  func.func @transform_5(%arg0: i32, %arg1: i32) -> (i32, i32, i32) {
    %c0_i32 = arith.constant 0 : i32
    %c0_i32_0 = arith.constant 0 : i32
    return %arg0, %arg1, %c0_i32 : i32, i32, i32
  }
  func.func @transform_6(%arg0: i32, %arg1: i32) -> (i32, i32, i32) {
    %c0_i32 = arith.constant 0 : i32
    %c0_i32_0 = arith.constant 0 : i32
    return %arg0, %arg1, %c0_i32 : i32, i32, i32
  }
}

</mosaic_0001>

<bundles_post_ra>
// kernel: tile.61
= control target key start
LH: loop header
LB: loop body
LE: loop exit
PB: predicated region body
PF: predicated region fallthrough
CT: control target
= control target key end

     0   :  { %s22_s0 = inlined_call_operand.vmem [shape: f32[4], index: 0, kind: input, shape index: {}]   ;;  %s23_s1 = inlined_call_operand.vmem [shape: f32[2,4], index: 1, kind: output, shape index: {}]  }
   0x1   :  { %v4_v0 = vld [vmem:[%s22_s0] ss:$0 sm:$0xff] }
   0x2   :  { %5 = vst [vmem:[%s23_s1] sm:$0x3] %v4_v0 }

// kernel: tile.3
= control target key start
LH: loop header
LB: loop body
LE: loop exit
PB: predicated region body
PF: predicated region fallthrough
CT: control target
= control target key end

     0   :  { %s35_s8 = smov 125   ;;  %vm8_vm0 = vcmask 7168   ;;  %s36_s11 = smov 126   ;;  %s62_s0 = inlined_call_operand.vmem [shape: f32[2,4], index: 0, kind: input, shape index: {}]   ;;  %s63_s1 = inlined_call_operand.vmem [shape: f32[1,8,1], index: 1, kind: output, shape index: {}]  }
   0x1   :  { %v5_v0 = vld [vmem:[%s62_s0] sm:$0x3]  ;;  %s34_s0 = smov 127  }
   0x2   :  { %6 = vst [vmem:[#allocation0] sm:$0x3] %v5_v0 }
   0x9   :  { %v10_v1 = vld [vmem:[#allocation0] sm:$0x3]  }
   0xa   :  { %v22_v2 = vld [vmem:[#allocation0] sm:$0x3]   ;;  %11 = vrot.lane.b32.xlu0 %v10_v1, %s34_s0 }
   0xb   :  { %23 = vrot.lane.b32.xlu1 %v22_v2, %s35_s8  ;;  %v7_v3 = vld [vmem:[#allocation0] sm:$0x3]  }
   0xc   :  { %v16_v4 = vld [vmem:[#allocation0] sm:$0x3]   ;;  %9 = vst.msk [vmem:[%s63_s1] ss:$4 sm:$0x3] %vm8_vm0, %v7_v3  }
   0xe   :  { %17 = vrot.lane.b32.xlu0 %v16_v4, %s36_s11 }
  0x7c   :  { %v12_v5 = vpop.permute.xlu0 %11  }
  0x7d   :  { %v24_v6 = vpop.permute.xlu1 %23   ;;  %28 = vst.msk [vmem:[%s63_s1 + $0x1] ss:$4 sm:$0x3] %vm8_vm0, %v12_v5  }
  0x7e   :  { %30 = vst.msk [vmem:[%s63_s1 + $0x3] ss:$4 sm:$0x3] %vm8_vm0, %v24_v6  }
  0x80   :  { %v18_v7 = vpop.permute.xlu0 %17  }
  0x81   :  { %29 = vst.msk [vmem:[%s63_s1 + $0x2] ss:$4 sm:$0x3] %vm8_vm0, %v18_v7  }

// kernel: custom-call.1
= control target key start
LH: loop header
LB: loop body
LE: loop exit
PB: predicated region body
PF: predicated region fallthrough
CT: control target
= control target key end

     0   :  { %s51_s0 = inlined_call_operand.hbm [shape: c64[2,4,16,16], index: 0, kind: input, shape index: {}]   ;;  %s52_s1 = inlined_call_operand.vmem [shape: f32[2,4,16,16], index: 1, kind: output, shape index: {}]  }
   0x1   :  { %s2_s8 = scalar_lea.hbm %s51_s0, 2048 }
   0x2   :  { %3 = vsyncpa [#allocation0], 0  ;;  %s4_s11 = sshll.u32 %s52_s1, 4  ;;  %s5_s11 = int_to_ptr.vmem [resolvable:$true] %s4_s11 }
   0x3   :  { %s20_s12 = scalar_lea.vmem %s5_s11, 2048  ;;  %p25_p1 = scmp.lt.s32.totalorder %s5_s11, %s5_s11 }
   0x4   :  { %p21_p0 = scmp.ne.s32.totalorder %s5_s11, %s20_s12  ;;  %p26_p2 = scmp.lt.s32.totalorder %s20_s12, %s20_s12 }
   0x6   :  { %p27_p3 = por %p26_p2, %p25_p1 }
   0x8   :  { %p28_p4 = pnand %p27_p3, %p21_p0 }
   0xa   :  { %31 = shalt.err (!%p28_p4)  }
   0xb   :  { %7 = dma.hbm_to_vmem [thread:$0]  %s2_s8, 2048, %s5_s11, [#allocation0] }
   0xc   :  { %33 = dma.done.wait [#allocation0], 2048  }
   0xd   :  { %34 = vsyncadd [#allocation0], 4294965248 }
   0xe   :  { %9 = vsyncpa [#allocation0], 1 }

// kernel: custom-call
= control target key start
LH: loop header
LB: loop body
LE: loop exit
PB: predicated region body
PF: predicated region fallthrough
CT: control target
= control target key end

     0   :  { %2 = vsyncpa [#allocation0], 0  ;;  %s47_s0 = inlined_call_operand.hbm [shape: c64[2,4,16,16], index: 0, kind: input, shape index: {}]   ;;  %s48_s1 = inlined_call_operand.vmem [shape: f32[2,4,16,16], index: 1, kind: output, shape index: {}]  }
   0x1   :  { %s3_s8 = sshll.u32 %s48_s1, 4  ;;  %s4_s8 = int_to_ptr.vmem [resolvable:$true] %s3_s8 }
   0x2   :  { %s17_s9 = scalar_lea.vmem %s4_s8, 2048  ;;  %p22_p1 = scmp.lt.s32.totalorder %s4_s8, %s4_s8 }
   0x3   :  { %p18_p0 = scmp.ne.s32.totalorder %s4_s8, %s17_s9  ;;  %p23_p2 = scmp.lt.s32.totalorder %s17_s9, %s17_s9 }
   0x5   :  { %p24_p3 = por %p23_p2, %p22_p1 }
   0x7   :  { %p25_p4 = pnand %p24_p3, %p18_p0 }
   0x9   :  { %28 = shalt.err (!%p25_p4)  }
   0xa   :  { %6 = dma.hbm_to_vmem [thread:$0]  %s47_s0, 2048, %s4_s8, [#allocation0] }
   0xb   :  { %29 = dma.done.wait [#allocation0], 2048  }
   0xc   :  { %30 = vsyncadd [#allocation0], 4294965248 }
   0xd   :  { %8 = vsyncpa [#allocation0], 1 }

// kernel: squeeze.3
= control target key start
LH: loop header
LB: loop body
LE: loop exit
PB: predicated region body
PF: predicated region fallthrough
CT: control target
= control target key end

     0   :  { %s185_s8 = smov 96   ;;  %s186_s9 = smov 112   ;;  %vm3_vm0 = vcmask 130048   ;;  %s358_s0 = inlined_call_operand.vmem [shape: f32[1,8,256], index: 0, kind: input, shape index: {}]   ;;  %s359_s1 = inlined_call_operand.vmem [shape: f32[2,4,16,16], index: 1, kind: output, shape index: {}]  }
   0x1   :  { %v36_v0 = vld.sshfl [vmem:[%s358_s0] sm:$0xff pattern:$0xb3a29180]   ;;  %v150_v1 = vld.sshfl [vmem:[%s358_s0 + $0x4] sm:$0xff pattern:$0xb3a29180]  }
   0x2   :  { %37 = vrot.lane.b32.xlu1 %v36_v0, %s185_s8  ;;  %20 = vrot.lane.b32.xlu0 %v36_v0, %s186_s9  ;;  %s187_s12 = smov 80   ;;  %v2_v2 = vld [vmem:[%s358_s0] sm:$0xff]   ;;  %v138_v3 = vld [vmem:[%s358_s0 + $0x8] sm:$0xff]   ;;  %s188_s3 = smov 64  }
   0x3   :  { %4 = vst.msk [vmem:[%s359_s1] ss:$16 sm:$0x3] %vm3_vm0, %v2_v2   ;;  %5 = vst.msk [vmem:[%s359_s1] ss:$16 sm:$0xc] %vm3_vm0, %v2_v2  }
   0x4   :  { %6 = vst.msk [vmem:[%s359_s1] ss:$16 sm:$0x30] %vm3_vm0, %v2_v2   ;;  %7 = vst.msk [vmem:[%s359_s1] ss:$16 sm:$0xc0] %vm3_vm0, %v2_v2  }
   0x5   :  { %139 = vst.msk [vmem:[%s359_s1 + $0x8] ss:$16 sm:$0x3] %vm3_vm0, %v138_v3   ;;  %140 = vst.msk [vmem:[%s359_s1 + $0x8] ss:$16 sm:$0xc] %vm3_vm0, %v138_v3  }
   0x6   :  { %46 = vrot.lane.b32.xlu1 %v150_v1, %s185_s8  ;;  %29 = vrot.lane.b32.xlu0 %v150_v1, %s186_s9  ;;  %141 = vst.msk [vmem:[%s359_s1 + $0x8] ss:$16 sm:$0x30] %vm3_vm0, %v138_v3   ;;  %142 = vst.msk [vmem:[%s359_s1 + $0x8] ss:$16 sm:$0xc0] %vm3_vm0, %v138_v3  }
   0x7   :  { %s189_s4 = smov 48   ;;  %s190_s5 = smov 32  }
   0x8   :  { %s191_s6 = smov 16  }
   0xa   :  { %63 = vrot.lane.b32.xlu1 %v150_v1, %s187_s12  ;;  %54 = vrot.lane.b32.xlu0 %v36_v0, %s187_s12 }
   0xe   :  { %80 = vrot.lane.b32.xlu1 %v150_v1, %s188_s3  ;;  %71 = vrot.lane.b32.xlu0 %v36_v0, %s188_s3 }
  0x12   :  { %97 = vrot.lane.b32.xlu1 %v150_v1, %s189_s4  ;;  %88 = vrot.lane.b32.xlu0 %v36_v0, %s189_s4 }
  0x16   :  { %114 = vrot.lane.b32.xlu1 %v150_v1, %s190_s5  ;;  %105 = vrot.lane.b32.xlu0 %v36_v0, %s190_s5 }
  0x1a   :  { %131 = vrot.lane.b32.xlu1 %v150_v1, %s191_s6  ;;  %122 = vrot.lane.b32.xlu0 %v36_v0, %s191_s6 }
  0x74   :  { %v38_v4 = vpop.permute.xlu1 %37   ;;  %v21_v5 = vpop.permute.xlu0 %20  }
  0x75   :  { %148 = vst.msk [vmem:[%s359_s1 + $0x2] ss:$8 sm:$0xf] %vm3_vm0, %v38_v4   ;;  %149 = vst.msk [vmem:[%s359_s1 + $0x2] ss:$8 sm:$0xf0] %vm3_vm0, %v38_v4  }
  0x76   :  { %143 = vst.msk [vmem:[%s359_s1 + $0x1] ss:$8 sm:$0xf] %vm3_vm0, %v21_v5   ;;  %144 = vst.msk [vmem:[%s359_s1 + $0x1] ss:$8 sm:$0xf0] %vm3_vm0, %v21_v5  }
  0x78   :  { %v47_v6 = vpop.permute.xlu1 %46   ;;  %v30_v7 = vpop.permute.xlu0 %29  }
  0x79   :  { %151 = vst.msk [vmem:[%s359_s1 + $0x42] ss:$8 sm:$0xf] %vm3_vm0, %v47_v6   ;;  %152 = vst.msk [vmem:[%s359_s1 + $0x42] ss:$8 sm:$0xf0] %vm3_vm0, %v47_v6  }
  0x7a   :  { %146 = vst.msk [vmem:[%s359_s1 + $0x41] ss:$8 sm:$0xf] %vm3_vm0, %v30_v7   ;;  %147 = vst.msk [vmem:[%s359_s1 + $0x41] ss:$8 sm:$0xf0] %vm3_vm0, %v30_v7  }
  0x7c   :  { %v64_v8 = vpop.permute.xlu1 %63   ;;  %v55_v9 = vpop.permute.xlu0 %54  }
  0x7d   :  { %156 = vst.msk [vmem:[%s359_s1 + $0x43] ss:$8 sm:$0xf] %vm3_vm0, %v64_v8   ;;  %157 = vst.msk [vmem:[%s359_s1 + $0x43] ss:$8 sm:$0xf0] %vm3_vm0, %v64_v8  }
  0x7e   :  { %153 = vst.msk [vmem:[%s359_s1 + $0x3] ss:$8 sm:$0xf] %vm3_vm0, %v55_v9   ;;  %154 = vst.msk [vmem:[%s359_s1 + $0x3] ss:$8 sm:$0xf0] %vm3_vm0, %v55_v9  }
  0x80   :  { %v81_v10 = vpop.permute.xlu1 %80   ;;  %v72_v11 = vpop.permute.xlu0 %71  }
  0x81   :  { %161 = vst.msk [vmem:[%s359_s1 + $0x44] ss:$8 sm:$0xf] %vm3_vm0, %v81_v10   ;;  %162 = vst.msk [vmem:[%s359_s1 + $0x44] ss:$8 sm:$0xf0] %vm3_vm0, %v81_v10  }
  0x82   :  { %158 = vst.msk [vmem:[%s359_s1 + $0x4] ss:$8 sm:$0xf] %vm3_vm0, %v72_v11   ;;  %159 = vst.msk [vmem:[%s359_s1 + $0x4] ss:$8 sm:$0xf0] %vm3_vm0, %v72_v11  }
  0x84   :  { %v98_v12 = vpop.permute.xlu1 %97   ;;  %v89_v13 = vpop.permute.xlu0 %88  }
  0x85   :  { %166 = vst.msk [vmem:[%s359_s1 + $0x45] ss:$8 sm:$0xf] %vm3_vm0, %v98_v12   ;;  %167 = vst.msk [vmem:[%s359_s1 + $0x45] ss:$8 sm:$0xf0] %vm3_vm0, %v98_v12  }
  0x86   :  { %163 = vst.msk [vmem:[%s359_s1 + $0x5] ss:$8 sm:$0xf] %vm3_vm0, %v89_v13   ;;  %164 = vst.msk [vmem:[%s359_s1 + $0x5] ss:$8 sm:$0xf0] %vm3_vm0, %v89_v13  }
  0x88   :  { %v115_v14 = vpop.permute.xlu1 %114   ;;  %v106_v15 = vpop.permute.xlu0 %105  }
  0x89   :  { %171 = vst.msk [vmem:[%s359_s1 + $0x46] ss:$8 sm:$0xf] %vm3_vm0, %v115_v14   ;;  %172 = vst.msk [vmem:[%s359_s1 + $0x46] ss:$8 sm:$0xf0] %vm3_vm0, %v115_v14  }
  0x8a   :  { %168 = vst.msk [vmem:[%s359_s1 + $0x6] ss:$8 sm:$0xf] %vm3_vm0, %v106_v15   ;;  %169 = vst.msk [vmem:[%s359_s1 + $0x6] ss:$8 sm:$0xf0] %vm3_vm0, %v106_v15  }
  0x8c   :  { %v132_v16 = vpop.permute.xlu1 %131   ;;  %v123_v17 = vpop.permute.xlu0 %122  }
  0x8d   :  { %176 = vst.msk [vmem:[%s359_s1 + $0x47] ss:$8 sm:$0xf] %vm3_vm0, %v132_v16   ;;  %177 = vst.msk [vmem:[%s359_s1 + $0x47] ss:$8 sm:$0xf0] %vm3_vm0, %v132_v16  }
  0x8e   :  { %173 = vst.msk [vmem:[%s359_s1 + $0x7] ss:$8 sm:$0xf] %vm3_vm0, %v123_v17   ;;  %174 = vst.msk [vmem:[%s359_s1 + $0x7] ss:$8 sm:$0xf0] %vm3_vm0, %v123_v17  }

// kernel: custom-call.2
= control target key start
LH: loop header
LB: loop body
LE: loop exit
PB: predicated region body
PF: predicated region fallthrough
CT: control target
= control target key end

     0   :  { %s92_s0 = inlined_call_operand.vmem [shape: f32[2,4,16,16], index: 0, kind: input, shape index: {}]   ;;  %s93_s1 = inlined_call_operand.vmem [shape: f32[2,4,16,16], index: 1, kind: input, shape index: {}]   ;;  %s94_s2 = inlined_call_operand.hbm [shape: c64[2,4,16,16], index: 2, kind: output, shape index: {}]  }
   0x1   :  { %s3_s11 = scalar_lea.hbm %s94_s2, 2048 }
   0x2   :  { %4 = vsyncpa [#allocation0], 0  ;;  %s5_s14 = sshll.u32 %s92_s0, 4  ;;  %s6_s14 = int_to_ptr.vmem [resolvable:$true] %s5_s14 }
   0x3   :  { %s18_s15 = scalar_lea.vmem %s6_s14, 2048  ;;  %p23_p1 = scmp.lt.s32.totalorder %s6_s14, %s6_s14 }
   0x4   :  { %p19_p0 = scmp.ne.s32.totalorder %s6_s14, %s18_s15  ;;  %p24_p2 = scmp.lt.s32.totalorder %s18_s15, %s18_s15 }
   0x6   :  { %p25_p3 = por %p24_p2, %p23_p1 }
   0x8   :  { %p26_p4 = pnand %p25_p3, %p19_p0 }
   0xa   :  { %29 = shalt.err (!%p26_p4)  }
   0xb   :  { %8 = dma.vmem_to_hbm [thread:$0]  %s6_s14, 2048, %s94_s2, [#allocation0] }
   0xc   :  { %61 = dma.done.wait [#allocation0], 2048  }
   0xd   :  { %62 = vsyncadd [#allocation0], 4294965248 }
   0xe   :  { %10 = vsyncpa [#allocation0], 1 }
   0xf   :  { %11 = vsyncpa [#allocation1], 0  ;;  %s12_s0 = sshll.u32 %s93_s1, 4  ;;  %s13_s0 = int_to_ptr.vmem [resolvable:$true] %s12_s0 }
  0x10   :  { %s38_s20 = scalar_lea.vmem %s13_s0, 2048  ;;  %p43_p6 = scmp.lt.s32.totalorder %s13_s0, %s13_s0 }
  0x11   :  { %p39_p5 = scmp.ne.s32.totalorder %s13_s0, %s38_s20  ;;  %p44_p7 = scmp.lt.s32.totalorder %s38_s20, %s38_s20 }
  0x13   :  { %p45_p8 = por %p44_p7, %p43_p6 }
  0x15   :  { %p46_p9 = pnand %p45_p8, %p39_p5 }
  0x17   :  { %49 = shalt.err (!%p46_p9)  }
  0x18   :  { %15 = dma.vmem_to_hbm [thread:$0]  %s13_s0, 2048, %s3_s11, [#allocation1] }
  0x19   :  { %63 = dma.done.wait [#allocation1], 2048  }
  0x1a   :  { %64 = vsyncadd [#allocation1], 4294965248 }
  0x1b   :  { %17 = vsyncpa [#allocation1], 1 }

// kernel: fre_block_spa.1
= control target key start
LH: loop header
LB: loop body
LE: loop exit
PB: predicated region body
PF: predicated region fallthrough
CT: control target
= control target key end

     0   :  { %s1086_s21 = smov 0   ;;  %s1088_s22 = smov 0   ;;  %s1445_s0 = inlined_call_operand.vmem [shape: f32[2,8,256], index: 0, kind: input, shape index: {}]   ;;  %s1446_s1 = inlined_call_operand.vmem [shape: f32[9,256], index: 1, kind: input, shape index: {}]   ;;  %s1447_s2 = inlined_call_operand.vmem [shape: f32[2,8,9], index: 2, kind: input, shape index: {}]   ;;  %s1448_s3 = inlined_call_operand.vmem [shape: f32[2,8,1], index: 3, kind: input, shape index: {}]   ;;  %s1449_s4 = inlined_call_operand.vmem [shape: f32[2,8,9], index: 4, kind: input, shape index: {}]   ;;  %s1450_s5 = inlined_call_operand.vmem [shape: f32[2,8,1], index: 5, kind: input, shape index: {}]   ;;  %s1451_s6 = inlined_call_operand.vmem [shape: f32[2,8,256], index: 6, kind: output, shape index: {}]  }
   0x1   :  { %s1090_s23 = smov 0  }
   0x2 LB: > { %s28_s24 = sadd.s32 1, %s1028_s22  ;;  %p934_p0 = scmp.ge.s32.totalorder %s1032_s23, 1  ;;  %s1032_s23 = sphi %s1090_s23, %s16_s23   ;;  %s1028_s22 = sphi %s1088_s22, %s1453_s22   ;;  %s1024_s21 = sphi %s1086_s21, %s1452_s21  }
   0x3   : > { %p30_p1 = scmp.ge.s32.totalorder %s28_s24, 2  ;;  %p288_p2 = scmp.lt.s32.totalorder %s1032_s23, 3 }
   0x5   : > { %s1455_s24 = smov (%p30_p1, %s28_s24), 0  ;;  %p289_p3 = pnand %p934_p0, %p288_p2 }
   0x6   : > { %p354_p4 = scmp.lt.s32.totalorder (!%p289_p3), %s1024_s21, 1  ;;  %s1036_s9 = smov (!%p289_p3), 17  }
   0x7   : > { %292 = sbr.rel (%p289_p3) target bundleno = 379 (0x17b), region = 44  ;;  %s1038_s10 = smov (!%p289_p3), 16  }
   0x8   : > { %s1040_s11 = smov (!%p289_p3), 15   ;;  %s1042_s12 = smov (!%p289_p3), 1  }
   0x9   : > { %s1044_s13 = smov (!%p289_p3), 127   ;;  %s1046_s14 = smov (!%p289_p3), 113  }
   0xa   : > { %s1049_s27 = smov (!%p289_p3), 112   ;;  %s1050_s28 = smov (!%p289_p3), 111  }
   0xc   : > { %v1034_v0 = vmov 0   ;;  %v1035_v1 = vmov 2   ;;  %s1457_s21 = smov (!%p354_p4, %s1024_s21), 1  ;;  %v1037_v5 = vmov 1   ;;  %v1039_v6 = vmov 3   ;;  %v1193_v32 = vld [vmem:[%s1446_s1] sm:$0xff] }
   0xd   : > { %990 = vset.pattern.permute.xlu0 %v1034_v0  ;;  %992 = vset.pattern.permute.xlu1 %v1035_v1  ;;  %s1108_s25 = sshll.u32 %s1457_s21, 3  ;;  %s947_s26 = sshll.u32 %s1457_s21, 4  ;;  %v1041_v7 = vmov 5   ;;  %v1043_v8 = vmov 4   ;;  %v1045_v9 = vmov 7   ;;  %v1047_v10 = vmov 6  }
   0xe   : > { %s369_s29 = scalar_lea.vmem %s1447_s2, %s1108_s25  ;;  %s362_s8 = scalar_lea.vmem %s1445_s0, %s947_s26  ;;  %v1048_v11 = vmov 8   ;;  %v412_v23 = vlaneseq  ;;  %v1198_v33 = vld [vmem:[%s1446_s1 + $0x8] sm:$0xff] }
   0xf   : > { %v406_v2 = vld [vmem:[%s369_s29] sm:$0xff]  ;;  %v1124_v4 = vld [vmem:[%s362_s8 + $0x8] sm:$0xff]  ;;  %s376_s17 = scalar_lea.vmem %s1448_s3, %s1108_s25  ;;  %s383_s20 = scalar_lea.vmem %s1449_s4, %s1108_s25 }
  0x10   : > { %v1120_v3 = vld [vmem:[%s362_s8] sm:$0xff]  ;;  %429 = vperm.xlu0 %990, %v406_v2   ;;  %v1180_v26 = vshrl.u32 %v412_v23, 7  ;;  %v1186_v29 = vand.u32 127, %v412_v23 }
  0x11   : > { %408 = vrot.lane.b32.xlu1 %v1120_v3, %s1036_s9  ;;  %v619_v12 = vld [vmem:[%s376_s17] sm:$0xff] }
  0x12   : > { %v1160_v13 = vld [vmem:[%s383_s20] sm:$0xff]  ;;  %v445_v30 = vsub.s32 1, %v1180_v26  ;;  %v419_v31 = vsub.s32 0, %v1180_v26  ;;  %vm440_vm0 = vcmp.lt.s32.totalorder %v1186_v29, 16  ;;  %v470_v34 = vsub.s32 2, %v1180_v26  ;;  %s390_s20 = scalar_lea.vmem %s1450_s5, %s1108_s25 }
  0x13   : > { %v495_v35 = vsub.s32 3, %v1180_v26  ;;  %vm414_vm1 = vcmp.lt.s32.totalorder %v1186_v29, 17  ;;  %vm465_vm2 = vcmp.lt.s32.totalorder %v1186_v29, 15  ;;  %vm490_vm3 = vcmp.lt.s32.totalorder %v1186_v29, 1 }
  0x14   : > { %991 = vset.pattern.permute.xlu0 %v1037_v5  ;;  %v1205_v37 = vrot.slane %v1193_v32, %v445_v30  ;;  %v1208_v38 = vrot.slane %v1198_v33, %v445_v30  ;;  %v1212_v40 = vrot.slane %v1193_v32, %v419_v31  ;;  %v1215_v41 = vrot.slane %v1198_v33, %v419_v31 }
  0x15   : > { %410 = vrot.lane.b32.xlu1 %v1124_v4, %s1036_s9  ;;  %454 = vperm.xlu0 %991, %v406_v2   ;;  %v1222_v44 = vrot.slane %v1193_v32, %v470_v34  ;;  %v1225_v45 = vrot.slane %v1198_v33, %v470_v34  ;;  %v1229_v46 = vrot.slane %v1193_v32, %v495_v35  ;;  %v528_v51 = vsub.s32 5, %v1180_v26 }
  0x16   : > { %v1238_v50 = vrot.slane %v1198_v33, %v495_v35  ;;  %v553_v58 = vsub.s32 6, %v1180_v26  ;;  %vm523_vm4 = vcmp.lt.s32.totalorder %v1186_v29, 127  ;;  %vm548_vm5 = vcmp.lt.s32.totalorder %v1186_v29, 113 }
  0x17   : > { %vm573_vm6 = vcmp.lt.s32.totalorder %v1186_v29, 112  ;;  %vm598_vm7 = vcmp.lt.s32.totalorder %v1186_v29, 111 }
  0x18   : > { %v1279_v23 = vrot.slane %v1198_v33, %v553_v58 }
  0x19   : > { %436 = vrot.lane.b32.xlu1 %v1120_v3, %s1038_s10  ;;  %438 = vrot.lane.b32.xlu0 %v1124_v4, %s1038_s10 }
  0x1a   : > { %993 = vset.pattern.permute.xlu0 %v1039_v6 }
  0x1d   : > { %479 = vperm.xlu1 %992, %v406_v2   ;;  %461 = vrot.lane.b32.xlu0 %v1120_v3, %s1040_s11 }
  0x21   : > { %463 = vrot.lane.b32.xlu1 %v1124_v4, %s1040_s11  ;;  %504 = vperm.xlu0 %993, %v406_v2  }
  0x22   : > { %995 = vset.pattern.permute.xlu1 %v1041_v7 }
  0x25   : > { %486 = vrot.lane.b32.xlu1 %v1120_v3, %s1042_s12  ;;  %994 = vset.pattern.permute.xlu0 %v1043_v8 }
  0x26   : > { %512 = vperm.xlu0 %994, %v406_v2  }
  0x29   : > { %488 = vrot.lane.b32.xlu1 %v1124_v4, %s1042_s12 }
  0x2a   : > { %521 = vrot.lane.b32.xlu0 %v1124_v4, %s1044_s13 }
  0x2b   : > { %997 = vset.pattern.permute.xlu0 %v1045_v9 }
  0x2d   : > { %537 = vperm.xlu1 %995, %v406_v2  }
  0x2e   : > { %544 = vrot.lane.b32.xlu0 %v1120_v3, %s1046_s14 }
  0x31   : > { %519 = vrot.lane.b32.xlu1 %v1120_v3, %s1044_s13 }
  0x32   : > { %996 = vset.pattern.permute.xlu1 %v1047_v10  ;;  %587 = vperm.xlu0 %997, %v406_v2  }
  0x35   : > { %562 = vperm.xlu1 %996, %v406_v2  }
  0x36   : > { %998 = vset.pattern.permute.xlu0 %v1048_v11 }
  0x37   : > { %612 = vperm.xlu0 %998, %v406_v2   ;;  %v1258_v2 = vrot.slane %v1193_v32, %v528_v51 }
  0x39   : > { %546 = vrot.lane.b32.xlu1 %v1124_v4, %s1046_s14 }
  0x3a   : > { %1000 = vset.pattern.permute.xlu1 %v1034_v0 }
  0x3b   : > { %999 = vset.pattern.permute.xlu0 %v1034_v0 }
  0x3c   : > { %622 = vperm.xlu0 %999, %v619_v12  }
  0x3d   : > { %569 = vrot.lane.b32.xlu1 %v1120_v3, %s1049_s27 }
  0x40   : > { %1002 = vset.pattern.permute.xlu0 %v1035_v1 }
  0x41   : > { %571 = vrot.lane.b32.xlu1 %v1124_v4, %s1049_s27  ;;  %673 = vperm.xlu0 %1002, %v1160_v13  }
  0x45   : > { %594 = vrot.lane.b32.xlu1 %v1120_v3, %s1050_s28  ;;  %1003 = vset.pattern.permute.xlu0 %v1039_v6 }
  0x46   : > { %689 = vperm.xlu0 %1003, %v1160_v13  }
  0x49   : > { %596 = vrot.lane.b32.xlu1 %v1124_v4, %s1050_s28 }
  0x4a   : > { %1004 = vset.pattern.permute.xlu0 %v1043_v8 }
  0x4b   : > { %697 = vperm.xlu0 %1004, %v1160_v13  }
  0x4d   : > { %641 = vperm.xlu1 %1000, %v1160_v13  }
  0x4f   : > { %1007 = vset.pattern.permute.xlu0 %v1045_v9  ;;  %v1263_v9 = vrot.slane %v1198_v33, %v528_v51 }
  0x50   : > { %745 = vperm.xlu0 %1007, %v1160_v13  }
  0x51   : > { %1001 = vset.pattern.permute.xlu1 %v1037_v5 }
  0x52   : > { %657 = vperm.xlu1 %1001, %v1160_v13  }
  0x54   : > { %1008 = vset.pattern.permute.xlu0 %v1048_v11  ;;  %v578_v11 = vsub.s32 7, %v1180_v26 }
  0x56   : > { %1005 = vset.pattern.permute.xlu1 %v1041_v7  ;;  %v1289_v31 = vrot.slane %v1193_v32, %v578_v11  ;;  %v1292_v34 = vrot.slane %v1198_v33, %v578_v11 }
  0x57   : > { %713 = vperm.xlu1 %1005, %v1160_v13  }
  0x5b   : > { %1006 = vset.pattern.permute.xlu1 %v1047_v10  ;;  %v1267_v10 = vrot.slane %v1193_v32, %v553_v58 }
  0x5c   : > { %729 = vperm.xlu1 %1006, %v1160_v13  }
  0x83   : > { %v409_v14 = vpop.permute.xlu1 %408 }
  0x87   : > { %v411_v15 = vpop.permute.xlu1 %410 }
  0x88   : > { %v415_v52 = vsel %vm414_vm1, %v409_v14, %v411_v15  ;;  %v416_v53 = vsel %vm414_vm1, %v411_v15, %v409_v14 }
  0x89   : > { %v425_v63 = vmul.f32 %v1212_v40, %v416_v53  ;;  %v426_v1 = vmul.f32 %v1215_v41, %v415_v52 }
  0x8b   : > { %v437_v16 = vpop.permute.xlu1 %436  ;;  %v1176_v17 = vpop.permute.xlu0 %429 }
  0x8c   : > { %v432_v12 = vmul.f32 %v1176_v17, %v425_v63  ;;  %v433_v14 = vmul.f32 %v1176_v17, %v426_v1 }
  0x90   : > { %v455_v19 = vpop.permute.xlu0 %454 }
  0x94   : > { %v439_v21 = vpop.permute.xlu0 %438 }
  0x95   : > { %v441_v42 = vsel %vm440_vm0, %v437_v16, %v439_v21  ;;  %v442_v43 = vsel %vm440_vm0, %v439_v21, %v437_v16 }
  0x96   : > { %v451_v54 = vmul.f32 %v1205_v37, %v442_v43  ;;  %v452_v55 = vmul.f32 %v1208_v38, %v441_v42 }
  0x98   : > { %v1178_v18 = vpop.permute.xlu1 %479  ;;  %v462_v24 = vpop.permute.xlu0 %461  ;;  %v457_v5 = vmul.f32 %v455_v19, %v451_v54  ;;  %v458_v6 = vmul.f32 %v455_v19, %v452_v55 }
  0x9c   : > { %v464_v20 = vpop.permute.xlu1 %463  ;;  %v1182_v27 = vpop.permute.xlu0 %504 }
  0x9d   : > { %v466_v48 = vsel %vm465_vm2, %v462_v24, %v464_v20  ;;  %v467_v49 = vsel %vm465_vm2, %v464_v20, %v462_v24  ;;  %v459_v24 = vadd.f32 %v457_v5, %v432_v12 }
  0x9e   : > { %v476_v59 = vmul.f32 %v1222_v44, %v467_v49  ;;  %v477_v60 = vmul.f32 %v1225_v45, %v466_v48 }
  0xa0   : > { %v487_v22 = vpop.permute.xlu1 %486  ;;  %v482_v15 = vmul.f32 %v1178_v18, %v476_v59  ;;  %v483_v16 = vmul.f32 %v1178_v18, %v477_v60 }
  0xa1   : > { %v513_v39 = vpop.permute.xlu0 %512 }
  0xa2   : > { %v484_v35 = vadd.f32 %v482_v15, %v459_v24  ;;  %v516_v49 = vmul.f32 %v513_v39, %v1124_v4 }
  0xa4   : > { %v489_v25 = vpop.permute.xlu1 %488 }
  0xa5   : > { %v491_v56 = vsel %vm490_vm3, %v487_v22, %v489_v25  ;;  %v492_v57 = vsel %vm490_vm3, %v489_v25, %v487_v22  ;;  %v522_v61 = vpop.permute.xlu0 %521  ;;  %v460_v25 = vadd.f32 %v458_v6, %v433_v14 }
  0xa6   : > { %v501_v7 = vmul.f32 %v1229_v46, %v492_v57  ;;  %v502_v8 = vmul.f32 %v1238_v50, %v491_v56 }
  0xa8   : > { %v1184_v28 = vpop.permute.xlu1 %537  ;;  %v507_v17 = vmul.f32 %v1182_v27, %v501_v7  ;;  %v508_v26 = vmul.f32 %v1182_v27, %v502_v8  ;;  %v515_v27 = vmul.f32 %v513_v39, %v1120_v3 }
  0xa9   : > { %v545_v19 = vpop.permute.xlu0 %544 }
  0xaa   : > { %v509_v52 = vadd.f32 %v507_v17, %v484_v35 }
  0xac   : > { %v520_v36 = vpop.permute.xlu1 %519  ;;  %v517_v58 = vadd.f32 %v515_v27, %v509_v52 }
  0xad   : > { %v524_v21 = vsel %vm523_vm4, %v520_v36, %v522_v61  ;;  %v525_v22 = vsel %vm523_vm4, %v522_v61, %v520_v36  ;;  %v485_v36 = vadd.f32 %v483_v16, %v460_v25  ;;  %v588_v55 = vpop.permute.xlu0 %587 }
  0xae   : > { %v534_v42 = vmul.f32 %v1258_v2, %v524_v21  ;;  %v535_v43 = vmul.f32 %v1263_v9, %v525_v22 }
  0xaf   : > { %v510_v33 = vadd.f32 %v508_v26, %v485_v36 }
  0xb0   : > { %v1231_v47 = vpop.permute.xlu1 %562  ;;  %v540_v56 = vmul.f32 %v1184_v28, %v534_v42  ;;  %v541_v57 = vmul.f32 %v1184_v28, %v535_v43  ;;  %v1319_v28 = vld [vmem:[%s1446_s1 + $0x18] ss:$0 sm:$0xff]  ;;  %v768_v43 = vld [vmem:[%s390_s20] sm:$0xff] }
  0xb1   : > { %v518_v59 = vadd.f32 %v516_v49, %v510_v33 }
  0xb2   : > { %v542_v63 = vadd.f32 %v540_v56, %v517_v58  ;;  %v613_v8 = vpop.permute.xlu0 %612 }
  0xb3   : > { %v543_v1 = vadd.f32 %v541_v57, %v518_v59 }
  0xb4   : > { %v547_v62 = vpop.permute.xlu1 %546 }
  0xb5   : > { %v549_v18 = vsel %vm548_vm5, %v545_v19, %v547_v62  ;;  %v550_v30 = vsel %vm548_vm5, %v547_v62, %v545_v19  ;;  %v1314_v62 = vld [vmem:[%s1446_s1 + $0x10] ss:$0 sm:$0xff] }
  0xb6   : > { %v559_v53 = vmul.f32 %v1267_v10, %v549_v18  ;;  %v560_v54 = vmul.f32 %v1279_v23, %v550_v30 }
  0xb7   : > { %v623_v17 = vpop.permute.xlu0 %622 }
  0xb8   : > { %v570_v20 = vpop.permute.xlu1 %569  ;;  %v565_v60 = vmul.f32 %v1231_v47, %v559_v53  ;;  %v566_v61 = vmul.f32 %v1231_v47, %v560_v54 }
  0xba   : > { %v567_v12 = vadd.f32 %v565_v60, %v542_v63  ;;  %v568_v14 = vadd.f32 %v566_v61, %v543_v1 }
  0xbc   : > { %v572_v48 = vpop.permute.xlu1 %571  ;;  %v674_v27 = vpop.permute.xlu0 %673 }
  0xbd   : > { %v574_v51 = vsel %vm573_vm6, %v570_v20, %v572_v48  ;;  %v575_v32 = vsel %vm573_vm6, %v572_v48, %v570_v20 }
  0xbe   : > { %v584_v3 = vmul.f32 %v1289_v31, %v574_v51  ;;  %v585_v4 = vmul.f32 %v1292_v34, %v575_v32 }
  0xc0   : > { %v595_v39 = vpop.permute.xlu1 %594  ;;  %v590_v5 = vmul.f32 %v588_v55, %v584_v3  ;;  %v591_v6 = vmul.f32 %v588_v55, %v585_v4 }
  0xc1   : > { %v690_v51 = vpop.permute.xlu0 %689 }
  0xc2   : > { %v592_v19 = vadd.f32 %v590_v5, %v567_v12  ;;  %v593_v20 = vadd.f32 %v591_v6, %v568_v14 }
  0xc4   : > { %v597_v7 = vpop.permute.xlu1 %596 }
  0xc5   : > { %v599_v11 = vsel %vm598_vm7, %v595_v39, %v597_v7  ;;  %v600_v47 = vsel %vm598_vm7, %v597_v7, %v595_v39 }
  0xc6   : > { %v609_v15 = vmul.f32 %v1314_v62, %v599_v11  ;;  %v610_v16 = vmul.f32 %v1319_v28, %v600_v47  ;;  %v698_v52 = vpop.permute.xlu0 %697 }
  0xc8   : > { %v615_v21 = vmul.f32 %v613_v8, %v609_v15  ;;  %v616_v22 = vmul.f32 %v613_v8, %v610_v16 }
  0xca   : > { %v617_v24 = vadd.f32 %v615_v21, %v592_v19  ;;  %v618_v25 = vadd.f32 %v616_v22, %v593_v20 }
  0xcb   : > { %v1373_v53 = vpop.permute.xlu0 %745 }
  0xcc   : > { %v625_v26 = vadd.f32 %v623_v17, %v617_v24  ;;  %v626_v18 = vadd.f32 %v623_v17, %v618_v25 }
  0xce   : > { %v627_v30 = vmul.f32 0.1, %v625_v26  ;;  %v628_v35 = vmul.f32 0.1, %v626_v18 }
  0xd0   : > { %v1327_v36 = vmax.f32 %v625_v26, %v627_v30  ;;  %v1329_v42 = vmax.f32 %v626_v18, %v628_v35 }
  0xd2   : > { %633 = vrot.lane.b32.xlu1 %v1329_v42, %s1036_s9  ;;  %631 = vrot.lane.b32.xlu0 %v1327_v36, %s1036_s9 }
  0xd6   : > { %650 = vrot.lane.b32.xlu1 %v1329_v42, %s1038_s10  ;;  %648 = vrot.lane.b32.xlu0 %v1327_v36, %s1038_s10 }
  0xda   : > { %664 = vrot.lane.b32.xlu1 %v1327_v36, %s1040_s11  ;;  %706 = vrot.lane.b32.xlu0 %v1329_v42, %s1044_s13 }
  0xde   : > { %666 = vrot.lane.b32.xlu1 %v1329_v42, %s1040_s11  ;;  %720 = vrot.lane.b32.xlu0 %v1327_v36, %s1046_s14  ;;  %s399_s11 = scalar_lea.vmem %s1451_s6, %s947_s26 }
  0xe2   : > { %680 = vrot.lane.b32.xlu1 %v1327_v36, %s1042_s12  ;;  %761 = vperm.xlu0 %1008, %v1160_v13  }
  0xe6   : > { %682 = vrot.lane.b32.xlu1 %v1329_v42, %s1042_s12  ;;  %1009 = vset.pattern.permute.xlu0 %v1034_v0  ;;  %v642_v0 = vpop.permute.xlu1 %641 }
  0xe7   : > { %771 = vperm.xlu0 %1009, %v768_v43  }
  0xea   : > { %704 = vrot.lane.b32.xlu1 %v1327_v36, %s1044_s13  ;;  %v658_v13 = vpop.permute.xlu1 %657 }
  0xee   : > { %722 = vrot.lane.b32.xlu1 %v1329_v42, %s1046_s14  ;;  %v1369_v48 = vpop.permute.xlu1 %713 }
  0xf2   : > { %736 = vrot.lane.b32.xlu1 %v1327_v36, %s1049_s27  ;;  %v1371_v49 = vpop.permute.xlu1 %729 }
  0xf6   : > { %738 = vrot.lane.b32.xlu1 %v1329_v42, %s1049_s27 }
  0xfa   : > { %752 = vrot.lane.b32.xlu1 %v1327_v36, %s1050_s28 }
  0xfe   : > { %754 = vrot.lane.b32.xlu1 %v1329_v42, %s1050_s28 }
 0x144   : > { %v634_v32 = vpop.permute.xlu1 %633  ;;  %v632_v55 = vpop.permute.xlu0 %631 }
 0x145   : > { %v635_v59 = vsel %vm414_vm1, %v632_v55, %v634_v32  ;;  %v636_v60 = vsel %vm414_vm1, %v634_v32, %v632_v55 }
 0x146   : > { %v637_v11 = vmul.f32 %v636_v60, %v1212_v40  ;;  %v638_v47 = vmul.f32 %v635_v59, %v1215_v41 }
 0x148   : > { %v651_v33 = vpop.permute.xlu1 %650  ;;  %v649_v3 = vpop.permute.xlu0 %648  ;;  %v644_v21 = vmul.f32 %v642_v0, %v637_v11  ;;  %v645_v22 = vmul.f32 %v642_v0, %v638_v47 }
 0x149   : > { %v652_v4 = vsel %vm440_vm0, %v649_v3, %v651_v33  ;;  %v653_v39 = vsel %vm440_vm0, %v651_v33, %v649_v3  ;;  %v700_v33 = vmul.f32 %v698_v52, %v1327_v36 }
 0x14a   : > { %v654_v1 = vmul.f32 %v653_v39, %v1205_v37  ;;  %v655_v5 = vmul.f32 %v652_v4, %v1208_v38 }
 0x14c   : > { %v665_v54 = vpop.permute.xlu1 %664  ;;  %v660_v15 = vmul.f32 %v658_v13, %v654_v1  ;;  %v661_v16 = vmul.f32 %v658_v13, %v655_v5  ;;  %v707_v19 = vpop.permute.xlu0 %706 }
 0x14e   : > { %v662_v17 = vadd.f32 %v660_v15, %v644_v21  ;;  %v663_v40 = vadd.f32 %v661_v16, %v645_v22 }
 0x150   : > { %v667_v56 = vpop.permute.xlu1 %666 }
 0x151   : > { %v668_v61 = vsel %vm465_vm2, %v665_v54, %v667_v56  ;;  %v669_v63 = vsel %vm465_vm2, %v667_v56, %v665_v54  ;;  %v701_v54 = vmul.f32 %v698_v52, %v1329_v42 }
 0x152   : > { %v670_v12 = vmul.f32 %v669_v63, %v1222_v44  ;;  %v671_v14 = vmul.f32 %v668_v61, %v1225_v45 }
 0x154   : > { %v681_v57 = vpop.permute.xlu1 %680  ;;  %v676_v24 = vmul.f32 %v674_v27, %v670_v12  ;;  %v677_v25 = vmul.f32 %v674_v27, %v671_v14 }
 0x156   : > { %v678_v44 = vadd.f32 %v676_v24, %v662_v17  ;;  %v679_v30 = vadd.f32 %v677_v25, %v663_v40 }
 0x158   : > { %v683_v58 = vpop.permute.xlu1 %682 }
 0x159   : > { %v684_v6 = vsel %vm490_vm3, %v681_v57, %v683_v58  ;;  %v685_v7 = vsel %vm490_vm3, %v683_v58, %v681_v57 }
 0x15a   : > { %v686_v37 = vmul.f32 %v685_v7, %v1229_v46  ;;  %v687_v38 = vmul.f32 %v684_v6, %v1238_v50  ;;  %v721_v50 = vpop.permute.xlu0 %720 }
 0x15c   : > { %v705_v8 = vpop.permute.xlu1 %704  ;;  %v692_v26 = vmul.f32 %v690_v51, %v686_v37  ;;  %v693_v41 = vmul.f32 %v690_v51, %v687_v38 }
 0x15d   : > { %v708_v45 = vsel %vm523_vm4, %v705_v8, %v707_v19  ;;  %v709_v46 = vsel %vm523_vm4, %v707_v19, %v705_v8 }
 0x15e   : > { %v694_v35 = vadd.f32 %v692_v26, %v678_v44  ;;  %v695_v43 = vadd.f32 %v693_v41, %v679_v30  ;;  %v710_v27 = vmul.f32 %v708_v45, %v1258_v2  ;;  %v711_v51 = vmul.f32 %v709_v46, %v1263_v9  ;;  %v762_v60 = vpop.permute.xlu0 %761 }
 0x160   : > { %v723_v20 = vpop.permute.xlu1 %722  ;;  %v702_v4 = vadd.f32 %v700_v33, %v694_v35  ;;  %v703_v39 = vadd.f32 %v701_v54, %v695_v43  ;;  %v716_v2 = vmul.f32 %v1369_v48, %v710_v27  ;;  %v717_v9 = vmul.f32 %v1369_v48, %v711_v51 }
 0x161   : > { %v724_v0 = vsel %vm548_vm5, %v721_v50, %v723_v20  ;;  %v725_v13 = vsel %vm548_vm5, %v723_v20, %v721_v50 }
 0x162   : > { %v726_v57 = vmul.f32 %v724_v0, %v1267_v10  ;;  %v727_v3 = vmul.f32 %v725_v13, %v1279_v23  ;;  %v718_v61 = vadd.f32 %v716_v2, %v702_v4  ;;  %v719_v10 = vadd.f32 %v717_v9, %v703_v39  ;;  %v772_v12 = vpop.permute.xlu0 %771 }
 0x164   : > { %v737_v18 = vpop.permute.xlu1 %736  ;;  %v732_v58 = vmul.f32 %v1371_v49, %v726_v57  ;;  %v733_v59 = vmul.f32 %v1371_v49, %v727_v3 }
 0x166   : > { %v734_v49 = vadd.f32 %v732_v58, %v718_v61  ;;  %v735_v6 = vadd.f32 %v733_v59, %v719_v10 }
 0x168   : > { %v739_v32 = vpop.permute.xlu1 %738 }
 0x169   : > { %v740_v55 = vsel %vm573_vm6, %v737_v18, %v739_v32  ;;  %v741_v56 = vsel %vm573_vm6, %v739_v32, %v737_v18 }
 0x16a   : > { %v742_v36 = vmul.f32 %v740_v55, %v1289_v31  ;;  %v743_v42 = vmul.f32 %v741_v56, %v1292_v34 }
 0x16c   : > { %v753_v52 = vpop.permute.xlu1 %752  ;;  %v748_v23 = vmul.f32 %v1373_v53, %v742_v36  ;;  %v749_v63 = vmul.f32 %v1373_v53, %v743_v42 }
 0x16e   : > { %v750_v11 = vadd.f32 %v748_v23, %v734_v49  ;;  %v751_v47 = vadd.f32 %v749_v63, %v735_v6 }
 0x170   : > { %v755_v1 = vpop.permute.xlu1 %754 }
 0x171   : > { %v756_v48 = vsel %vm598_vm7, %v753_v52, %v755_v1  ;;  %v757_v31 = vsel %vm598_vm7, %v755_v1, %v753_v52 }
 0x172   : > { %v758_v34 = vmul.f32 %v1314_v62, %v756_v48  ;;  %v759_v5 = vmul.f32 %v1319_v28, %v757_v31 }
 0x174   : > { %v764_v7 = vmul.f32 %v762_v60, %v758_v34  ;;  %v765_v8 = vmul.f32 %v762_v60, %v759_v5 }
 0x176   : > { %v766_v14 = vadd.f32 %v764_v7, %v750_v11  ;;  %v767_v53 = vadd.f32 %v765_v8, %v751_v47 }
 0x178   : > { %v774_v29 = vadd.f32 %v772_v12, %v766_v14  ;;  %v775_v15 = vadd.f32 %v772_v12, %v767_v53 }
 0x17a   : > { %776 = vst [vmem:[%s399_s11] sm:$0xff] %v774_v29  ;;  %777 = vst [vmem:[%s399_s11 + $0x8] sm:$0xff] %v775_v15 }
 0x17b PF: > { %s16_s23 = sadd.s32 1, %s1032_s23   ;;  %s1452_s21 = smov %s1028_s22 }
 0x17c   : > { %p13_p5 = scmp.ge.s32.totalorder %s16_s23, 4   ;;  %s1453_s22 = smov %s1455_s24 }
 0x17e   :  { %15 = sbr.rel (!%p13_p5) target bundleno = 2 (0x2), region = 86 }

</bundles_post_ra>
